<compile_context>
chip_gen: v6e
topology: v6e:2x2x1
jax: 0.10.0
libtpu: 0.0.40
codegen_flags: <defaults>
</compile_context>

<pallas_src>
import functools

import jax
import jax.numpy as jnp
from jax.experimental import pallas as pl
from jax.experimental.pallas import tpu as pltpu


def _round_up(x, m):
    return ((x + m - 1) // m) * m


def _diagmat_kernel(x1_ref, x2_ref, w_ref, o_ref, acc_ref, *,
                    n_total, tile_n, mask_n):
    """One (tile_b, tile_n) block of x1/x2 and a (1, tile_n) weight slice.

    Grid = (batch tiles, feature tiles); feature axis (k) is the reduction.
    """
    k = pl.program_id(1)

    @pl.when(k == 0)
    def _init():
        acc_ref[...] = jnp.zeros_like(acc_ref)

    # f32 accumulation regardless of input dtype (VPU/XLU work is hidden
    # under the HBM DMA -- this kernel is purely memory bound).
    x1 = x1_ref[...].astype(jnp.float32)      # (tile_b, tile_n)
    x2 = x2_ref[...].astype(jnp.float32)      # (tile_b, tile_n)
    w = w_ref[...].astype(jnp.float32)        # (1, tile_n) -> broadcasts over rows
    prod = x1 * w * x2

    if mask_n:
        # Ragged feature tail: zero out lanes past N so they do not pollute
        # the row sums (tail *rows* need no mask -- their output is dropped).
        col = k * tile_n + jax.lax.broadcasted_iota(jnp.int32, prod.shape, 1)
        prod = jnp.where(col < n_total, prod, 0.0)

    acc_ref[...] += jnp.sum(prod, axis=1, keepdims=True)   # XLU lane reduce

    @pl.when(k == pl.num_programs(1) - 1)
    def _finalize():
        o_ref[...] = acc_ref[...].astype(o_ref.dtype)


def diagmat_forward(x1, x2, weight, *, tile_b=None, tile_n=None,
                    target_block_bytes=8 * 1024 * 1024,
                    force_pallas=False):
    """x1, x2: (B, N); weight: (1, N) -> (B, 1)."""
    B, N = x1.shape
    assert x2.shape == (B, N)
    assert weight.shape == (1, N)

    out_dtype = x1.dtype
    itemsize = jnp.dtype(x1.dtype).itemsize
    # Sublane packing: 8 rows for 4-byte dtypes, 16 for 2-byte, 32 for 1-byte.
    pack = max(8, 32 // itemsize)

    # Small-problem fallback: fixed pallas_call / grid-step overhead dominates,
    # and XLA can fuse this into neighboring ops.
    if not force_pallas and 2 * B * N * itemsize < (1 << 20):
        res = jnp.sum(
            x1.astype(jnp.float32) * weight.astype(jnp.float32) * x2.astype(jnp.float32),
            axis=1, keepdims=True)
        return res.astype(out_dtype)

    # --- tile_n: feature (lane / reduction) axis -----------------------------
    if tile_n is None:
        row_block_bytes = N * itemsize * pack
        if row_block_bytes <= target_block_bytes:
            tile_n = N                                   # whole feature dim per block
        else:
            tile_n = (target_block_bytes // (pack * itemsize)) // 128 * 128
            tile_n = max(128, tile_n)
            if tile_n >= N:
                tile_n = N
    assert tile_n == N or tile_n % 128 == 0

    # --- tile_b: batch (sublane) axis ----------------------------------------
    if tile_b is None:
        rows = target_block_bytes // max(1, tile_n * itemsize)
        tile_b = max(pack, (rows // pack) * pack)
    if tile_b >= B:
        tile_b = B          # full-dim block is always a legal block shape
    assert tile_b == B or tile_b % 8 == 0

    grid_b = pl.cdiv(B, tile_b)
    grid_n = pl.cdiv(N, tile_n)
    mask_n = (N % tile_n) != 0

    # VMEM budget derived from the actual footprint (+ headroom for compiler
    # internal scratch); defaults land around 40 MiB, safe under v7x's 64 MiB.
    block_bytes = tile_b * tile_n * itemsize
    vmem_need = (
        2 * 2 * block_bytes                                    # x1, x2 double-buffered
        + 2 * tile_n * jnp.dtype(weight.dtype).itemsize        # weight blocks
        + 2 * _round_up(tile_b, 8) * 128 * jnp.dtype(out_dtype).itemsize  # padded out
        + _round_up(tile_b, 8) * 128 * 4)                      # padded f32 accumulator
    vmem_limit = int(min(max(vmem_need + (8 << 20), 32 << 20), 64 << 20))

    kernel = functools.partial(
        _diagmat_kernel, n_total=N, tile_n=tile_n, mask_n=mask_n)

    out = pl.pallas_call(
        kernel,
        out_shape=jax.ShapeDtypeStruct((B, 1), out_dtype),
        grid=(grid_b, grid_n),
        in_specs=[
            pl.BlockSpec((tile_b, tile_n), lambda i, k: (i, k)),
            pl.BlockSpec((tile_b, tile_n), lambda i, k: (i, k)),
            pl.BlockSpec((1, tile_n), lambda i, k: (0, k)),    # weight slice
        ],
        out_specs=pl.BlockSpec((tile_b, 1), lambda i, k: (i, 0)),
        scratch_shapes=[pltpu.VMEM((tile_b, 1), jnp.float32)],
        compiler_params=pltpu.CompilerParams(
            dimension_semantics=("parallel", "arbitrary"),
            vmem_limit_bytes=vmem_limit,
        ),
    )(x1, x2, weight)
    return out


if __name__ == "__main__":
    key = jax.random.PRNGKey(0)
    k1, k2, k3, k4, k5, k6 = jax.random.split(key, 6)

    # Case 1: small demo shape matching the module layout (B rows, N features).
    # force_pallas=True so the Pallas kernel itself is exercised.
    B, N = 8, 32
    x1 = jax.random.normal(k1, (B, N), dtype=jnp.float32)
    x2 = jax.random.normal(k2, (B, N), dtype=jnp.float32)
    weight = jnp.ones((1, N), dtype=jnp.float32)   # torch.FloatTensor(1, n).fill_(1)
    out = jax.block_until_ready(diagmat_forward(x1, x2, weight, force_pallas=True))
    ref = jnp.sum(x1 * weight * x2, axis=1, keepdims=True)
    assert out.shape == (B, 1)
    assert jnp.allclose(out, ref, atol=1e-5, rtol=1e-5)

    # Case 2: ragged batch (B % tile_b != 0) -> clipped last batch block,
    # no wrapper-side padding, tail output rows dropped on writeback.
    B2, N2 = 20, 256
    y1 = jax.random.normal(k3, (B2, N2), dtype=jnp.float32)
    y2 = jax.random.normal(k4, (B2, N2), dtype=jnp.float32)
    w2 = jax.random.normal(k5, (1, N2), dtype=jnp.float32)
    out2 = jax.block_until_ready(
        diagmat_forward(y1, y2, w2, tile_b=16, force_pallas=True))
    ref2 = jnp.sum(y1 * w2 * y2, axis=1, keepdims=True)
    assert out2.shape == (B2, 1)
    assert jnp.allclose(out2, ref2, atol=1e-4, rtol=1e-4)

    # Case 3: tiled + ragged feature dim (N % tile_n != 0) -> multi-step
    # accumulation over the reduction axis plus in-kernel lane masking.
    B3, N3 = 16, 300
    z1 = jax.random.normal(k6, (B3, N3), dtype=jnp.float32)
    z2 = jax.random.normal(k1, (B3, N3), dtype=jnp.float32)
    w3 = jnp.ones((1, N3), dtype=jnp.float32)
    out3 = jax.block_until_ready(
        diagmat_forward(z1, z2, w3, tile_n=128, force_pallas=True))
    ref3 = jnp.sum(z1 * w3 * z2, axis=1, keepdims=True)
    assert out3.shape == (B3, 1)
    assert jnp.allclose(out3, ref3, atol=1e-4, rtol=1e-4)

    # Case 4: small-problem fallback path (pure XLA).
    out4 = jax.block_until_ready(diagmat_forward(x1, x2, weight))
    assert out4.shape == (B, 1)
    assert jnp.allclose(out4, ref, atol=1e-5, rtol=1e-5)

    print("KERNEL_OK")
</pallas_src>

<mosaic_0001>
module attributes {stable_mosaic.version = 11 : i64} {
  func.func @_diagmat_kernel(%arg0: i32, %arg1: i32, %arg2: memref<8x32xf32, #tpu.memory_space<vmem>>, %arg3: memref<8x32xf32, #tpu.memory_space<vmem>>, %arg4: memref<1x32xf32, #tpu.memory_space<vmem>>, %arg5: memref<8x1xf32, #tpu.memory_space<vmem>>, %arg6: memref<8x1xf32, #tpu.memory_space<vmem>>) attributes {dimension_semantics = [#tpu.dimension_semantics<parallel>, #tpu.dimension_semantics<arbitrary>], iteration_bounds = array<i64: 1, 1>, scalar_prefetch = 0 : i64, scratch_operands = 1 : i64, tpu.core_type = #tpu.core_type<tc>, window_params = [{transform_indices = @transform_0, window_bounds = array<i64: 8, 32>}, {transform_indices = @transform_1, window_bounds = array<i64: 8, 32>}, {transform_indices = @transform_2, window_bounds = array<i64: 1, 32>}, {transform_indices = @transform_3, window_bounds = array<i64: 8, 1>}]} {
    %c0_i32 = arith.constant 0 : i32
    %0 = arith.cmpi eq, %arg1, %c0_i32 : i32
    %1 = arith.extui %0 : i1 to i32
    %c0_i32_0 = arith.constant 0 : i32
    %2 = arith.cmpi ne, %1, %c0_i32_0 : i32
    scf.if %2 {
      %cst_12 = arith.constant 0.000000e+00 : f32
      %17 = vector.broadcast %cst_12 : f32 to vector<8x1xf32>
      %c0_13 = arith.constant 0 : index
      %c0_14 = arith.constant 0 : index
      %18 = vector.load %arg6[%c0_13, %c0_14] : memref<8x1xf32, #tpu.memory_space<vmem>>, vector<8x1xf32>
      tpu.vector_store %arg6[%c0_13, %c0_14], %17 {strides = array<i32>} : memref<8x1xf32, #tpu.memory_space<vmem>>, vector<8x1xf32>,
    } else {
    }
    %c0 = arith.constant 0 : index
    %c0_1 = arith.constant 0 : index
    %3 = vector.load %arg2[%c0, %c0_1] : memref<8x32xf32, #tpu.memory_space<vmem>>, vector<8x32xf32>
    %c0_2 = arith.constant 0 : index
    %c0_3 = arith.constant 0 : index
    %4 = vector.load %arg3[%c0_2, %c0_3] : memref<8x32xf32, #tpu.memory_space<vmem>>, vector<8x32xf32>
    %c0_4 = arith.constant 0 : index
    %c0_5 = arith.constant 0 : index
    %5 = vector.load %arg4[%c0_4, %c0_5] : memref<1x32xf32, #tpu.memory_space<vmem>>, vector<1x32xf32>
    %6 = vector.broadcast %5 : vector<1x32xf32> to vector<8x32xf32>
    %7 = arith.mulf %3, %6 : vector<8x32xf32>
    %8 = arith.mulf %7, %4 : vector<8x32xf32>
    %c0_6 = arith.constant 0 : index
    %c0_7 = arith.constant 0 : index
    %9 = vector.load %arg6[%c0_6, %c0_7] : memref<8x1xf32, #tpu.memory_space<vmem>>, vector<8x1xf32>
    %cst = arith.constant dense<0.000000e+00> : vector<8xf32>
    %10 = vector.multi_reduction <add>, %8, %cst [1] : vector<8x32xf32> to vector<8xf32>
    %11 = vector.shape_cast %10 : vector<8xf32> to vector<8x1xf32>
    %12 = arith.addf %9, %11 : vector<8x1xf32>
    %c0_8 = arith.constant 0 : index
    %c0_9 = arith.constant 0 : index
    %13 = vector.load %arg6[%c0_8, %c0_9] : memref<8x1xf32, #tpu.memory_space<vmem>>, vector<8x1xf32>
    tpu.vector_store %arg6[%c0_8, %c0_9], %12 {strides = array<i32>} : memref<8x1xf32, #tpu.memory_space<vmem>>, vector<8x1xf32>,
    %c0_i32_10 = arith.constant 0 : i32
    %14 = arith.cmpi eq, %arg1, %c0_i32_10 : i32
    %15 = arith.extui %14 : i1 to i32
    %c0_i32_11 = arith.constant 0 : i32
    %16 = arith.cmpi ne, %15, %c0_i32_11 : i32
    scf.if %16 {
      %c0_12 = arith.constant 0 : index
      %c0_13 = arith.constant 0 : index
      %17 = vector.load %arg6[%c0_12, %c0_13] : memref<8x1xf32, #tpu.memory_space<vmem>>, vector<8x1xf32>
      %c0_14 = arith.constant 0 : index
      %c0_15 = arith.constant 0 : index
      %18 = vector.load %arg5[%c0_14, %c0_15] : memref<8x1xf32, #tpu.memory_space<vmem>>, vector<8x1xf32>
      tpu.vector_store %arg5[%c0_14, %c0_15], %17 {strides = array<i32>} : memref<8x1xf32, #tpu.memory_space<vmem>>, vector<8x1xf32>,
    } else {
    }
    return
  }
  func.func @transform_0(%arg0: i32, %arg1: i32) -> (i32, i32) {
    %c0_i32 = arith.constant 0 : i32
    return %arg0, %arg1 : i32, i32
  }
  func.func @transform_1(%arg0: i32, %arg1: i32) -> (i32, i32) {
    %c0_i32 = arith.constant 0 : i32
    return %arg0, %arg1 : i32, i32
  }
  func.func @transform_2(%arg0: i32, %arg1: i32) -> (i32, i32) {
    %c0_i32 = arith.constant 0 : i32
    %c0_i32_0 = arith.constant 0 : i32
    return %c0_i32, %arg1 : i32, i32
  }
  func.func @transform_3(%arg0: i32, %arg1: i32) -> (i32, i32) {
    %c0_i32 = arith.constant 0 : i32
    %c0_i32_0 = arith.constant 0 : i32
    return %arg0, %c0_i32 : i32, i32
  }
}

</mosaic_0001>

<bundles_post_ra>
// kernel: tpu_custom_call.1
= control target key start
LH: loop header
LB: loop body
LE: loop exit
PB: predicated region body
PF: predicated region fallthrough
CT: control target
= control target key end

     0   :  { %8 = vsyncpa [#allocation4], 0  ;;  %s160_s0 = inlined_call_operand.hbm [shape: f32[8,32], index: 0, kind: input, shape index: {}]   ;;  %s161_s1 = inlined_call_operand.hbm [shape: f32[8,32], index: 1, kind: input, shape index: {}]   ;;  %s162_s2 = inlined_call_operand.vmem [shape: f32[1,32], index: 2, kind: input, shape index: {}]   ;;  %s163_s3 = inlined_call_operand.vmem [shape: f32[8,1], index: 3, kind: output, shape index: {}]  }
   0x1   :  { %9 = vsyncpa [#allocation6], 0  ;;  %s122_s12 = smov [#allocation3]   ;;  %s123_s14 = smov [#allocation5]  }
   0x2   :  { %s16_s13 = sshll.u32 %s122_s12, 4  ;;  %s26_s15 = sshll.u32 %s123_s14, 4  ;;  %s17_s13 = int_to_ptr.vmem [resolvable:$true] %s16_s13  ;;  %s27_s15 = int_to_ptr.vmem [resolvable:$true] %s26_s15 }
   0x3   :  { %s86_s16 = scalar_lea.vmem %s17_s13, 128  ;;  %p91_p1 = scmp.lt.s32.totalorder %s17_s13, %s17_s13 }
   0x4   :  { %p87_p0 = scmp.ne.s32.totalorder %s17_s13, %s86_s16  ;;  %p92_p2 = scmp.lt.s32.totalorder %s86_s16, %s86_s16 }
   0x6   :  { %p93_p3 = por %p92_p2, %p91_p1 }
   0x8   :  { %p94_p4 = pnand %p93_p3, %p87_p0 }
   0xa   :  { %97 = shalt.err (!%p94_p4)
}
   0xb   :  { %19 = dma.hbm_to_vmem [thread:$0]  %s160_s0, 128, %s17_s13, [#allocation4]  }
   0xc   :  { %s106_s19 = scalar_lea.vmem %s27_s15, 128  ;;  %p111_p6 = scmp.lt.s32.totalorder %s27_s15, %s27_s15 }
   0xd   :  { %p107_p5 = scmp.ne.s32.totalorder %s27_s15, %s106_s19  ;;  %p112_p7 = scmp.lt.s32.totalorder %s106_s19, %s106_s19 }
   0xf   :  { %p113_p8 = por %p112_p7, %p111_p6 }
  0x11   :  { %p114_p9 = pnand %p113_p8, %p107_p5 }
  0x13   :  { %117 = shalt.err (!%p114_p9)
}
  0x14   :  { %29 = dma.hbm_to_vmem [thread:$0]  %s161_s1, 128, %s27_s15, [#allocation6]  }
  0x15   :  { %118 = dma.done.wait [#allocation4], 128  }
  0x16   :  { %119 = vsyncadd [#allocation4], 4294967168 }
  0x17   :  { %120 = dma.done.wait [#allocation6], 128  }
  0x18   :  { %121 = vsyncadd [#allocation6], 4294967168  ;;  %vm42_vm0 = vcmask 7168   ;;  %v124_v0 = vmov 0.0   ;;  %v44_v1 = vld [vmem:[#allocation3] sm:$0xff]  ;;  %v45_v2 = vld [vmem:[#allocation5] sm:$0xff] }
  0x19   :  { %43 = vst.msk [vmem:[#allocation2] sm:$0xff] %vm42_vm0, %v124_v0  ;;  %v74_v3 = vld [vmem:[%s162_s2] ss:$0 sm:$0xff]  ;;  %vm56_vm1 = vcmask 261120  }
  0x1a   :  { %v53_v4 = vmul.f32 %v74_v3, %v44_v1 }
  0x1c   :  { %v54_v5 = vmul.f32 %v53_v4, %v45_v2 }
  0x1e   :  { %v57_v6 = vsel %vm56_vm1, %v54_v5, 0.0 }
  0x1f   :  { %58 = vadd.xlane.f32.xlu0 %v57_v6 }
  0x20   :  { %v55_v7 = vld [vmem:[#allocation2] sm:$0xff] }
  0xa8   :  { %v59_v8 = vpop.xlane.xlu0 %58 }
  0xa9   :  { %v60_v9 = vadd.f32 %v59_v8, %v55_v7 }
  0xab   :  { %62 = vst.msk [vmem:[#allocation2] sm:$0xff] %vm42_vm0, %v60_v9 }
  0xb2   :  { %v66_v10 = vld [vmem:[#allocation2] sm:$0xff] }
  0xb3   :  { %67 = vst.msk [vmem:[%s163_s3] sm:$0xff] %vm42_vm0, %v66_v10 }
  0xb4   :  { %72 = vsyncpa [#allocation4], 1 }
  0xb5   :  { %73 = vsyncpa [#allocation6], 1 }

</bundles_post_ra>
